<compile_context>
chip_gen: v7x
topology: tpu7x:2x2x1
jax: 0.10.0
libtpu: 0.0.40
codegen_flags: <defaults>
</compile_context>

<pallas_src>
import functools

import jax
import jax.numpy as jnp
from jax import lax
from jax.experimental import pallas as pl
from jax.experimental.pallas import tpu as pltpu


def _admm_y_kernel(L_ref, L2_ref, F_ref, Y2_ref, Z_ref, Y_ref,
                   *, p, n_iter, out_type, use_bf16):
    """Runs the full n_iter ADMM recurrence on VMEM-resident operands.

    L_ref / L2_ref already carry the 1/(1+p) scale and the MXU operand dtype
    (bf16 or f32), folded in by the wrapper.
    """
    mxu_dtype = jnp.bfloat16 if use_bf16 else jnp.float32

    def step(Y2, Z):
        # F is re-read from its VMEM ref (no extra live N_p x M_p f32 copy).
        F = F_ref[...]
        # Y1 = 1/(1+p) * L @ (F + p*Y2 + Z)      (scale folded into L_ref)
        T1 = F + p * Y2 + Z
        Y1 = jnp.dot(L_ref[...], T1.astype(mxu_dtype),
                     preferred_element_type=jnp.float32)
        # Y2 = 1/(1+p) * (F + p*Y1 - Z) @ L_2    (scale folded into L2_ref)
        T2 = F + p * Y1 - Z
        Y2n = jnp.dot(T2.astype(mxu_dtype), L2_ref[...],
                      preferred_element_type=jnp.float32)
        # Z = Z + p * (Y2 - Y1)
        Zn = Z + p * (Y2n - Y1)
        return Y1, Y2n, Zn

    # Iteration 0 is peeled: the dead zeros-init Y1 carry disappears and the
    # remaining loop only carries what the requested output needs.
    Y1, Y2, Z = step(Y2_ref[...], Z_ref[...])

    if n_iter > 1:
        unroll = True if n_iter <= 4 else 2
        if out_type == 'y2':
            # Y1 from earlier iterations is never needed -> 2-buffer carry.
            def body(_, c):
                _, y2, z = step(c[0], c[1])
                return (y2, z)
            Y2, Z = lax.fori_loop(1, n_iter, body, (Y2, Z), unroll=unroll)
        else:
            def body(_, c):
                return step(c[1], c[2])
            Y1, Y2, Z = lax.fori_loop(1, n_iter, body, (Y1, Y2, Z),
                                      unroll=unroll)

    if out_type == 'y2':
        Y = Y2
    elif out_type == 'y1':
        Y = Y1
    else:  # 'mean'
        Y = 0.5 * (Y1 + Y2)

    Y_ref[...] = Y.astype(Y_ref.dtype)


def _round_up(x, m):
    return (x + m - 1) // m * m


def _pad2(x, rows, cols):
    r, c = x.shape
    if r == rows and c == cols:
        return x
    return jnp.pad(x, ((0, rows - r), (0, cols - c)))


def _vmem_limit_bytes(headroom=0.85):
    """Generation-aware VMEM budget (~110 MiB on v5e/v6e, ~56 MiB on v7x)."""
    try:
        cap = int(pltpu.get_tpu_info().vmem_capacity_bytes)
    except Exception:
        cap = 64 << 20  # conservative fallback (v7x per-core capacity)
    return int(cap * headroom)


def admm_y_forward(L, L_2, F, Y2, Z, *, p, n_iter=2, out_type='mean',
                   use_bf16=True):
    """Pallas wrapper: pads to MXU/lane-dense shapes, folds the 1/(1+p) scale
    and operator dtype into the (small) operators, runs one VMEM-resident
    kernel invocation, slices the result back.

    Output is always f32. With use_bf16=True the MXU operands are bf16 with
    f32 accumulation; rounding error compounds with n_iter (keep
    use_bf16=False for exact-f32 semantics or large n_iter).
    """
    N, M = F.shape
    assert L.shape == (N, N) and L_2.shape == (M, M)
    assert Y2.shape == (N, M) and Z.shape == (N, M)
    assert out_type in ('mean', 'y1', 'y2')
    assert n_iter >= 1

    # MXU/lane-dense padding: both N and M go to multiples of 128 so neither
    # contraction dim nor any lane dim is masked or under-filled on the MXU.
    # Zero padding is exactly semantics-preserving for this recurrence
    # (padded rows/cols of every iterate stay zero).
    N_p = _round_up(N, 128)
    M_p = _round_up(M, 128)

    inv_1p = 1.0 / (1.0 + float(p))
    op_dtype = jnp.bfloat16 if use_bf16 else jnp.float32

    # Fold 1/(1+p) and the MXU-operand cast into the operators wrapper-side:
    # halves operator HBM->VMEM bytes (bf16) and removes duplicate operator
    # copies / prologue VPU passes from the kernel.
    Lp = _pad2((inv_1p * L.astype(jnp.float32)).astype(op_dtype), N_p, N_p)
    L2p = _pad2((inv_1p * L_2.astype(jnp.float32)).astype(op_dtype), M_p, M_p)
    Fp = _pad2(F.astype(jnp.float32), N_p, M_p)
    Y2p = _pad2(Y2.astype(jnp.float32), N_p, M_p)
    Zp = _pad2(Z.astype(jnp.float32), N_p, M_p)

    kernel = functools.partial(
        _admm_y_kernel, p=float(p), n_iter=int(n_iter), out_type=out_type,
        use_bf16=bool(use_bf16))

    # Whole arrays live in VMEM for the single grid step: no block pipeline,
    # no double-buffering.
    vmem_spec = pl.BlockSpec(memory_space=pltpu.MemorySpace.VMEM)

    op_bytes = Lp.size * Lp.dtype.itemsize + L2p.size * L2p.dtype.itemsize
    nm_bytes = 4 * N_p * M_p
    flops = int(n_iter) * (2 * N_p * N_p * M_p + 2 * N_p * M_p * M_p
                           + 8 * N_p * M_p)
    cost = pl.CostEstimate(flops=int(flops), transcendentals=0,
                           bytes_accessed=int(op_bytes + 4 * nm_bytes))

    out_p = pl.pallas_call(
        kernel,
        out_shape=jax.ShapeDtypeStruct((N_p, M_p), jnp.float32),
        in_specs=[vmem_spec] * 5,            # L, L_2, F, Y2, Z
        out_specs=vmem_spec,
        input_output_aliases={4: 0},         # Z (wrapper temp) donates its HBM buffer
        compiler_params=pltpu.CompilerParams(
            vmem_limit_bytes=_vmem_limit_bytes()),
        cost_estimate=cost,
    )(Lp, L2p, Fp, Y2p, Zp)

    return out_p[:N, :M]


def admm_y_reference(L, L_2, F, Y2, Z, *, p, n_iter=2, out_type='mean'):
    """Pure-JAX f32 reference mirroring the PyTorch module exactly."""
    inv_1p = 1.0 / (1.0 + p)
    Y1 = jnp.zeros_like(F)
    for _ in range(n_iter):
        Y1 = inv_1p * (L @ (F + p * Y2 + Z))
        Y2 = inv_1p * ((F + p * Y1 - Z) @ L_2)
        Z = Z + p * (Y2 - Y1)
    if out_type == 'y2':
        return Y2
    if out_type == 'y1':
        return Y1
    return 0.5 * (Y1 + Y2)


if __name__ == "__main__":
    # Small synthetic problem consistent with the module's __init__:
    #   L: (N, N), A2: (M, M), F/Y2/Z: (N, M)
    N, M = 32, 48
    p = 0.5
    lambda_1 = 0.3   # unused in forward (kept for parity with module signature)
    lambda_2 = 0.1
    n_iter = 2

    key = jax.random.PRNGKey(0)
    kL, kA2, kF, kY2, kZ = jax.random.split(key, 5)

    # Deterministic "parameters" of the module.
    L = jax.random.normal(kL, (N, N), dtype=jnp.float32) / jnp.sqrt(N)
    A2 = jax.random.normal(kA2, (M, M), dtype=jnp.float32) / jnp.sqrt(M)
    A2 = 0.5 * (A2 + A2.T)                                # symmetric adjacency-like op
    L_2 = jnp.eye(M, dtype=jnp.float32) - lambda_2 * A2   # I_2 - lambda_2 * A2

    # Forward inputs.
    F = jax.random.normal(kF, (N, M), dtype=jnp.float32)
    Y2 = jax.random.normal(kY2, (N, M), dtype=jnp.float32)
    Z = jax.random.normal(kZ, (N, M), dtype=jnp.float32)

    # 1) exact-semantics checks: f32 MXU path vs f32 reference, all out types.
    for Type in ('mean', 'y1', 'y2'):
        ref = admm_y_reference(L, L_2, F, Y2, Z, p=p, n_iter=n_iter,
                               out_type=Type)
        out_f32 = admm_y_forward(L, L_2, F, Y2, Z, p=p, n_iter=n_iter,
                                 out_type=Type, use_bf16=False)
        out_f32 = jax.block_until_ready(out_f32)
        assert out_f32.shape == (N, M) and out_f32.dtype == jnp.float32
        assert jnp.allclose(out_f32, ref, atol=1e-3, rtol=1e-3), \
            f"f32 mismatch vs reference (Type={Type})"

    # 2) fast path: bf16 MXU operands, f32 accumulate (loosened tolerance).
    ref_mean = admm_y_reference(L, L_2, F, Y2, Z, p=p, n_iter=n_iter,
                                out_type='mean')
    out = admm_y_forward(L, L_2, F, Y2, Z, p=p, n_iter=n_iter,
                         out_type='mean', use_bf16=True)
    out = jax.block_until_ready(out)
    assert out.shape == (N, M) and out.dtype == jnp.float32
    assert jnp.allclose(out, ref_mean, atol=1e-1, rtol=1e-1), \
        "bf16 mismatch vs reference"

    print("KERNEL_OK")
</pallas_src>

<mosaic_0001>
module attributes {stable_mosaic.version = 11 : i64} {
  func.func @_admm_y_kernel(%arg0: memref<128x128xf32, #tpu.memory_space<vmem>>, %arg1: memref<128x128xf32, #tpu.memory_space<vmem>>, %arg2: memref<128x128xf32, #tpu.memory_space<vmem>>, %arg3: memref<128x128xf32, #tpu.memory_space<vmem>>, %arg4: memref<128x128xf32, #tpu.memory_space<vmem>>, %arg5: memref<128x128xf32, #tpu.memory_space<vmem>>) attributes {dimension_semantics = [], scalar_prefetch = 0 : i64, scratch_operands = 0 : i64, tpu.core_type = #tpu.core_type<tc>} {
    %c0 = arith.constant 0 : index
    %c0_0 = arith.constant 0 : index
    %0 = vector.load %arg3[%c0, %c0_0] : memref<128x128xf32, #tpu.memory_space<vmem>>, vector<128x128xf32>
    %c0_1 = arith.constant 0 : index
    %c0_2 = arith.constant 0 : index
    %1 = vector.load %arg4[%c0_1, %c0_2] : memref<128x128xf32, #tpu.memory_space<vmem>>, vector<128x128xf32>
    %c0_3 = arith.constant 0 : index
    %c0_4 = arith.constant 0 : index
    %2 = vector.load %arg2[%c0_3, %c0_4] : memref<128x128xf32, #tpu.memory_space<vmem>>, vector<128x128xf32>
    %cst = arith.constant 5.000000e-01 : f32
    %3 = vector.broadcast %cst : f32 to vector<128x128xf32>
    %4 = arith.mulf %3, %0 : vector<128x128xf32>
    %5 = arith.addf %2, %4 : vector<128x128xf32>
    %6 = arith.addf %5, %1 : vector<128x128xf32>
    %c0_5 = arith.constant 0 : index
    %c0_6 = arith.constant 0 : index
    %7 = vector.load %arg0[%c0_5, %c0_6] : memref<128x128xf32, #tpu.memory_space<vmem>>, vector<128x128xf32>
    %cst_7 = arith.constant dense<0.000000e+00> : vector<128x128xf32>
    %8 = tpu.matmul %7, %6, %cst_7 {dimension_numbers = #tpu.dot_dimension_numbers<[1], [0], [0], [1], [0, 0, 1, 1], [], []>} : vector<128x128xf32>, vector<128x128xf32>, vector<128x128xf32> -> vector<128x128xf32>
    %cst_8 = arith.constant 5.000000e-01 : f32
    %9 = vector.broadcast %cst_8 : f32 to vector<128x128xf32>
    %10 = arith.mulf %9, %8 : vector<128x128xf32>
    %11 = arith.addf %2, %10 : vector<128x128xf32>
    %12 = arith.subf %11, %1 : vector<128x128xf32>
    %c0_9 = arith.constant 0 : index
    %c0_10 = arith.constant 0 : index
    %13 = vector.load %arg1[%c0_9, %c0_10] : memref<128x128xf32, #tpu.memory_space<vmem>>, vector<128x128xf32>
    %cst_11 = arith.constant dense<0.000000e+00> : vector<128x128xf32>
    %14 = tpu.matmul %12, %13, %cst_11 {dimension_numbers = #tpu.dot_dimension_numbers<[1], [0], [0], [1], [0, 0, 1, 1], [], []>} : vector<128x128xf32>, vector<128x128xf32>, vector<128x128xf32> -> vector<128x128xf32>
    %15 = arith.subf %14, %8 : vector<128x128xf32>
    %cst_12 = arith.constant 5.000000e-01 : f32
    %16 = vector.broadcast %cst_12 : f32 to vector<128x128xf32>
    %17 = arith.mulf %16, %15 : vector<128x128xf32>
    %18 = arith.addf %1, %17 : vector<128x128xf32>
    %c0_i32 = arith.constant 0 : i32
    %c0_13 = arith.constant 0 : index
    %c0_14 = arith.constant 0 : index
    %19 = vector.load %arg2[%c0_13, %c0_14] : memref<128x128xf32, #tpu.memory_space<vmem>>, vector<128x128xf32>
    %cst_15 = arith.constant 5.000000e-01 : f32
    %20 = vector.broadcast %cst_15 : f32 to vector<128x128xf32>
    %21 = arith.mulf %20, %14 : vector<128x128xf32>
    %22 = arith.addf %19, %21 : vector<128x128xf32>
    %23 = arith.addf %22, %18 : vector<128x128xf32>
    %c0_16 = arith.constant 0 : index
    %c0_17 = arith.constant 0 : index
    %24 = vector.load %arg0[%c0_16, %c0_17] : memref<128x128xf32, #tpu.memory_space<vmem>>, vector<128x128xf32>
    %cst_18 = arith.constant dense<0.000000e+00> : vector<128x128xf32>
    %25 = tpu.matmul %24, %23, %cst_18 {dimension_numbers = #tpu.dot_dimension_numbers<[1], [0], [0], [1], [0, 0, 1, 1], [], []>} : vector<128x128xf32>, vector<128x128xf32>, vector<128x128xf32> -> vector<128x128xf32>
    %cst_19 = arith.constant 5.000000e-01 : f32
    %26 = vector.broadcast %cst_19 : f32 to vector<128x128xf32>
    %27 = arith.mulf %26, %25 : vector<128x128xf32>
    %28 = arith.addf %19, %27 : vector<128x128xf32>
    %29 = arith.subf %28, %18 : vector<128x128xf32>
    %c0_20 = arith.constant 0 : index
    %c0_21 = arith.constant 0 : index
    %30 = vector.load %arg1[%c0_20, %c0_21] : memref<128x128xf32, #tpu.memory_space<vmem>>, vector<128x128xf32>
    %cst_22 = arith.constant dense<0.000000e+00> : vector<128x128xf32>
    %31 = tpu.matmul %29, %30, %cst_22 {dimension_numbers = #tpu.dot_dimension_numbers<[1], [0], [0], [1], [0, 0, 1, 1], [], []>} : vector<128x128xf32>, vector<128x128xf32>, vector<128x128xf32> -> vector<128x128xf32>
    %32 = arith.subf %31, %25 : vector<128x128xf32>
    %cst_23 = arith.constant 5.000000e-01 : f32
    %33 = vector.broadcast %cst_23 : f32 to vector<128x128xf32>
    %34 = arith.mulf %33, %32 : vector<128x128xf32>
    %35 = arith.addf %18, %34 : vector<128x128xf32>
    %36 = arith.addf %25, %31 : vector<128x128xf32>
    %cst_24 = arith.constant 5.000000e-01 : f32
    %37 = vector.broadcast %cst_24 : f32 to vector<128x128xf32>
    %38 = arith.mulf %37, %36 : vector<128x128xf32>
    %c0_25 = arith.constant 0 : index
    %c0_26 = arith.constant 0 : index
    %39 = vector.load %arg5[%c0_25, %c0_26] : memref<128x128xf32, #tpu.memory_space<vmem>>, vector<128x128xf32>
    tpu.vector_store %arg5[%c0_25, %c0_26], %38 {strides = array<i32>} : memref<128x128xf32, #tpu.memory_space<vmem>>, vector<128x128xf32>,
    return
  }
}

</mosaic_0001>

<bundles_post_ra>
// kernel: tpu_custom_call.1
= control target key start
LH: loop header
LB: loop body
LE: loop exit
PB: predicated region body
PF: predicated region fallthrough
CT: control target
= control target key end

     0   :  { %10 = vsyncpa [#allocation3], 0  ;;  %s2287_s0 = inlined_call_operand.vmem [shape: f32[128,128], index: 0, kind: input, shape index: {}]   ;;  %s2288_s1 = inlined_call_operand.vmem [shape: f32[128,128], index: 1, kind: input, shape index: {}]   ;;  %s2289_s2 = inlined_call_operand.hbm [shape: f32[128,128], index: 2, kind: input, shape index: {}]   ;;  %s2290_s3 = inlined_call_operand.hbm [shape: f32[128,128], index: 3, kind: input, shape index: {}]   ;;  %s2291_s4 = inlined_call_operand.hbm [shape: f32[128,128], index: 4, kind: input, shape index: {}, may-alias: {4,5}]   ;;  %s2292_s5 = inlined_call_operand.hbm [shape: f32[128,128], index: 5, kind: output, shape index: {}, may-alias: {4,5}]  }
   0x1   :  { %11 = vsyncpa [#allocation6], 0 }
   0x2   :  { %12 = vsyncpa [#allocation4], 0  ;;  %s1608_s18 = smov [#allocation5]   ;;  %s1609_s20 = smov [#allocation2]  }
   0x3   :  { %s34_s19 = sshll.u32 %s1608_s18, 4  ;;  %s22_s21 = sshll.u32 %s1609_s20, 4  ;;  %s35_s19 = int_to_ptr.vmem [resolvable:$true] %s34_s19  ;;  %s1644_s21 = int_to_ptr.vmem [resolvable:$true] %s22_s21 }
   0x4   :  { %s1514_s24 = scalar_lea.hbm %s2290_s3, 2048 }
   0x5   :  { %p1515_p0 = scmp.ne.s32.totalorder %s2290_s3, %s1514_s24  ;;  %p1518_p1 = scmp.lt.u32.totalorder %s1514_s24, %s2290_s3 }
   0x7   :  { %p1520_p2 = pnand %p1518_p1, %p1515_p0 }
   0x9   :  { %1523 = shalt.err (!%p1520_p2)
}
   0xa   :  { %s1524_s29 = scalar_lea.vmem %s35_s19, 2048  ;;  %p1529_p4 = scmp.lt.s32.totalorder %s35_s19, %s35_s19 }
   0xb   :  { %p1525_p3 = scmp.ne.s32.totalorder %s35_s19, %s1524_s29  ;;  %p1530_p5 = scmp.lt.s32.totalorder %s1524_s29, %s1524_s29 }
   0xd   :  { %p1531_p6 = por %p1530_p5, %p1529_p4 }
   0xf   :  { %p1532_p7 = pnand %p1531_p6, %p1525_p3 }
  0x11   :  { %1535 = shalt.err (!%p1532_p7)
}
  0x12   :  { %s1610_s30 = smov 128   ;;  %s1611_s6 = smov 8  }
  0x13   :  { %40 = dma.hbm_to_vmem [thread:$0]  %s2290_s3, 2048, %s35_s19, [#allocation6], %s1610_s30, %s1610_s30, %s1611_s6  }
  0x14   :  { %s1536_s11 = scalar_lea.hbm %s2289_s2, 2048 }
  0x15   :  { %p1537_p8 = scmp.ne.s32.totalorder %s2289_s2, %s1536_s11  ;;  %p1540_p9 = scmp.lt.u32.totalorder %s1536_s11, %s2289_s2 }
  0x17   :  { %p1542_p10 = pnand %p1540_p9, %p1537_p8 }
  0x19   :  { %1545 = shalt.err (!%p1542_p10)
}
  0x1a   :  { %s1546_s16 = scalar_lea.vmem %s1644_s21, 2048  ;;  %p1551_p12 = scmp.lt.s32.totalorder %s1644_s21, %s1644_s21 }
  0x1b   :  { %p1547_p11 = scmp.ne.s32.totalorder %s1644_s21, %s1546_s16  ;;  %p1552_p13 = scmp.lt.s32.totalorder %s1546_s16, %s1546_s16 }
  0x1d   :  { %p1553_p0 = por %p1552_p13, %p1551_p12 }
  0x1f   :  { %p1554_p1 = pnand %p1553_p0, %p1547_p11 }
  0x21   :  { %1557 = shalt.err (!%p1554_p1)
}
  0x22   :  { %28 = dma.hbm_to_vmem [thread:$0]  %s2289_s2, 2048, %s1644_s21, [#allocation3], %s1610_s30, %s1610_s30, %s1611_s6  }
  0x23   :  { %s1612_s18 = smov [#allocation7]   ;;  %s1558_s23 = scalar_lea.hbm %s2291_s4, 2048 }
  0x24   :  { %s46_s19 = sshll.u32 %s1612_s18, 4  ;;  %p1559_p2 = scmp.ne.s32.totalorder %s2291_s4, %s1558_s23  ;;  %s47_s19 = int_to_ptr.vmem [resolvable:$true] %s46_s19 }
  0x25   :  { %p1562_p3 = scmp.lt.u32.totalorder %s1558_s23, %s2291_s4 }
  0x27   :  { %p1564_p4 = pnand %p1562_p3, %p1559_p2 }
  0x29   :  { %1567 = shalt.err (!%p1564_p4)
}
  0x2a   :  { %s1568_s28 = scalar_lea.vmem %s47_s19, 2048  ;;  %p1573_p6 = scmp.lt.s32.totalorder %s47_s19, %s47_s19 }
  0x2b   :  { %p1569_p5 = scmp.ne.s32.totalorder %s47_s19, %s1568_s28  ;;  %p1574_p7 = scmp.lt.s32.totalorder %s1568_s28, %s1568_s28 }
  0x2d   :  { %p1575_p8 = por %p1574_p7, %p1573_p6 }
  0x2f   :  { %p1576_p9 = pnand %p1575_p8, %p1569_p5 }
  0x31   :  { %1579 = shalt.err (!%p1576_p9)
}
  0x32   :  { %52 = dma.hbm_to_vmem [thread:$0]  %s2291_s4, 2048, %s47_s19, [#allocation6], %s1610_s30, %s1610_s30, %s1611_s6  }
  0x33   :  { %1602 = dma.done.wait [#allocation3], 2048  }
  0x34   :  { %1603 = vsyncadd [#allocation3], 4294965248 }
  0x35   :  { %1604 = dma.done.wait [#allocation6], 4096  }
  0x36   :  { %1605 = vsyncadd [#allocation6], 4294963200  ;;  %v62_v0 = vld [vmem:[#allocation5] sm:$0xff]  ;;  %v63_v1 = vld [vmem:[#allocation5 + $0x8] sm:$0xff] }
  0x37   :  { %v1696_v2 = vld [vmem:[#allocation7] sm:$0xff]  ;;  %v1700_v4 = vld [vmem:[#allocation2 + $0x8] sm:$0xff]  ;;  %v110_v5 = vmul.f32 0.5, %v62_v0  ;;  %v111_v6 = vmul.f32 0.5, %v63_v1  ;;  %v64_v8 = vld [vmem:[#allocation5 + $0x10] sm:$0xff] }
  0x38   :  { %v1698_v3 = vld [vmem:[#allocation2] sm:$0xff]  ;;  %v1702_v7 = vld [vmem:[#allocation7 + $0x8] sm:$0xff]  ;;  %v65_v9 = vld [vmem:[#allocation5 + $0x18] sm:$0xff]  ;;  %v112_v15 = vmul.f32 0.5, %v64_v8 }
  0x39   :  { %v126_v10 = vadd.f32 %v110_v5, %v1698_v3  ;;  %v127_v11 = vadd.f32 %v111_v6, %v1700_v4  ;;  %v1706_v12 = vld [vmem:[#allocation7 + $0x10] sm:$0xff]  ;;  %v1710_v14 = vld [vmem:[#allocation2 + $0x18] sm:$0xff]  ;;  %v113_v16 = vmul.f32 0.5, %v65_v9  ;;  %v66_v18 = vld [vmem:[#allocation5 + $0x20] sm:$0xff] }
  0x3a   :  { %v1708_v13 = vld [vmem:[#allocation2 + $0x10] sm:$0xff]  ;;  %v1712_v17 = vld [vmem:[#allocation7 + $0x18] sm:$0xff]  ;;  %v67_v19 = vld [vmem:[#allocation5 + $0x28] sm:$0xff]  ;;  %v114_v27 = vmul.f32 0.5, %v66_v18 }
  0x3b   :  { %v142_v20 = vadd.f32 %v126_v10, %v1696_v2  ;;  %v143_v21 = vadd.f32 %v127_v11, %v1702_v7  ;;  %v128_v22 = vadd.f32 %v112_v15, %v1708_v13  ;;  %v129_v23 = vadd.f32 %v113_v16, %v1710_v14  ;;  %v1718_v24 = vld [vmem:[#allocation2 + $0x20] sm:$0xff]  ;;  %v1720_v25 = vld [vmem:[#allocation2 + $0x28] sm:$0xff]  ;;  %v68_v29 = vld [vmem:[#allocation5 + $0x30] sm:$0xff] }
  0x3c   :  { %v1722_v26 = vld [vmem:[#allocation7 + $0x20] sm:$0xff]  ;;  %v115_v28 = vmul.f32 0.5, %v67_v19  ;;  %v69_v30 = vld [vmem:[#allocation5 + $0x38] sm:$0xff]  ;;  %v1726_v34 = vld [vmem:[#allocation7 + $0x28] sm:$0xff]  ;;  %v116_v37 = vmul.f32 0.5, %v68_v29  ;;  %v130_v38 = vadd.f32 %v114_v27, %v1718_v24 }
  0x3d   :  { %v1380_v31 = vpack.c.bf16 %v143_v21, %v142_v20  ;;  %v144_v32 = vadd.f32 %v128_v22, %v1706_v12  ;;  %v145_v33 = vadd.f32 %v129_v23, %v1712_v17  ;;  %v1728_v35 = vld [vmem:[#allocation2 + $0x30] sm:$0xff]  ;;  %v1730_v36 = vld [vmem:[#allocation2 + $0x38] sm:$0xff]  ;;  %v117_v41 = vmul.f32 0.5, %v69_v30  ;;  %v70_v42 = vld [vmem:[#allocation5 + $0x40] sm:$0xff] }
  0x3e   :  { %v131_v39 = vadd.f32 %v115_v28, %v1720_v25  ;;  %v1734_v40 = vld [vmem:[#allocation7 + $0x30] sm:$0xff]  ;;  %v71_v43 = vld [vmem:[#allocation5 + $0x48] sm:$0xff]  ;;  %v1736_v45 = vld [vmem:[#allocation7 + $0x38] sm:$0xff]  ;;  %v132_v46 = vadd.f32 %v116_v37, %v1728_v35  ;;  %v118_v49 = vmul.f32 0.5, %v70_v42  ;;  %v146_v51 = vadd.f32 %v130_v38, %v1722_v26 }
  0x3f   :  { %1381 = vmatprep.subr.bf16.mxu0 %v1380_v31  ;;  %v1384_v44 = vpack.c.bf16 %v145_v33, %v144_v32  ;;  %v1739_v47 = vld [vmem:[#allocation2 + $0x40] sm:$0xff]  ;;  %v1741_v48 = vld [vmem:[#allocation2 + $0x48] sm:$0xff]  ;;  %v119_v50 = vmul.f32 0.5, %v71_v43  ;;  %v133_v53 = vadd.f32 %v117_v41, %v1730_v36  ;;  %v72_v54 = vld [vmem:[#allocation5 + $0x50] sm:$0xff] }
  0x40   :  { %1383 = vmatpush3.bf16.msra.mxu0 %v1380_v31  ;;  %v147_v52 = vadd.f32 %v131_v39, %v1726_v34  ;;  %v73_v55 = vld [vmem:[#allocation5 + $0x58] sm:$0xff]  ;;  %v148_v56 = vadd.f32 %v132_v46, %v1734_v40  ;;  %v1747_v57 = vld [vmem:[#allocation7 + $0x40] sm:$0xff]  ;;  %v1749_v58 = vld [vmem:[#allocation7 + $0x48] sm:$0xff]  ;;  %v134_v59 = vadd.f32 %v118_v49, %v1739_v47  ;;  %v120_v62 = vmul.f32 0.5, %v72_v54 }
  0x41   :  { %1385 = vmatprep.subr.bf16.mxu0 %v1384_v44  ;;  %v135_v60 = vadd.f32 %v119_v50, %v1741_v48  ;;  %v1753_v61 = vld [vmem:[#allocation2 + $0x50] sm:$0xff]  ;;  %v149_v0 = vadd.f32 %v133_v53, %v1736_v45  ;;  %v1756_v1 = vld [vmem:[#allocation2 + $0x58] sm:$0xff]  ;;  %v121_v5 = vmul.f32 0.5, %v73_v55  ;;  %v74_v6 = vld [vmem:[#allocation5 + $0x60] sm:$0xff] }
  0x42   :  { %v1388_v63 = vpack.c.bf16 %v147_v52, %v146_v51  ;;  %v75_v8 = vld [vmem:[#allocation5 + $0x68] sm:$0xff]  ;;  %v150_v9 = vadd.f32 %v134_v59, %v1747_v57  ;;  %v1760_v11 = vld [vmem:[#allocation7 + $0x50] sm:$0xff]  ;;  %v122_v15 = vmul.f32 0.5, %v74_v6  ;;  %v1762_v18 = vld [vmem:[#allocation7 + $0x58] sm:$0xff]  ;;  %v136_v19 = vadd.f32 %v120_v62, %v1753_v61 }
  0x43   :  { %v151_v10 = vadd.f32 %v135_v60, %v1749_v58  ;;  %v1392_v16 = vpack.c.bf16 %v149_v0, %v148_v56  ;;  %v137_v20 = vadd.f32 %v121_v5, %v1756_v1  ;;  %v1766_v21 = vld [vmem:[#allocation2 + $0x60] sm:$0xff]  ;;  %v123_v22 = vmul.f32 0.5, %v75_v8  ;;  %v76_v23 = vld [vmem:[#allocation5 + $0x70] sm:$0xff]  ;;  %v1768_v27 = vld [vmem:[#allocation2 + $0x68] sm:$0xff] }
  0x44   :  { %1387 = vmatpush3.bf16.msra.mxu0 %v1384_v44  ;;  %v77_v28 = vld [vmem:[#allocation5 + $0x78] sm:$0xff]  ;;  %v1773_v29 = vld [vmem:[%s2287_s0] sm:$0xff]  ;;  %v138_v31 = vadd.f32 %v122_v15, %v1766_v21  ;;  %v124_v32 = vmul.f32 0.5, %v76_v23  ;;  %v152_v33 = vadd.f32 %v136_v19, %v1760_v11  ;;  %v1782_v41 = vld [vmem:[#allocation2 + $0x70] sm:$0xff] }
  0x45   :  { %1389 = vmatprep.subr.bf16.mxu0 %v1388_v63  ;;  %1188 = vmatprep.mubr.f32.mxu0 %v1773_v29  ;;  %v1396_v30 = vpack.c.bf16 %v151_v10, %v150_v9  ;;  %v153_v37 = vadd.f32 %v137_v20, %v1762_v18  ;;  %v1779_v38 = vld [vmem:[#allocation7 + $0x60] sm:$0xff]  ;;  %v139_v39 = vadd.f32 %v123_v22, %v1768_v27  ;;  %v125_v42 = vmul.f32 0.5, %v77_v28  ;;  %v1784_v43 = vld [vmem:[#allocation7 + $0x68] sm:$0xff]  ;;  %v1786_v44 = vld [vmem:[#allocation2 + $0x78] sm:$0xff] }
  0x46   :  { %v367_v46 = vld [vmem:[%s2288_s1] sm:$0xff]  ;;  %v368_v49 = vld [vmem:[%s2288_s1 + $0x8] sm:$0xff]  ;;  %v154_v50 = vadd.f32 %v138_v31, %v1779_v38  ;;  %v140_v51 = vadd.f32 %v124_v32, %v1782_v41  ;;  %v369_v53 = vld [vmem:[%s2288_s1 + $0x10] sm:$0xff] }
  0x47   :  { %v1796_v52 = vpack.c.bf16 %v368_v49, %v367_v46  ;;  %v370_v54 = vld [vmem:[%s2288_s1 + $0x18] sm:$0xff]  ;;  %v1400_v55 = vpack.c.bf16 %v153_v37, %v152_v33  ;;  %v155_v56 = vadd.f32 %v139_v39, %v1784_v43  ;;  %v141_v59 = vadd.f32 %v125_v42, %v1786_v44  ;;  %v371_v62 = vld [vmem:[%s2288_s1 + $0x20] sm:$0xff]  ;;  %v1814_v0 = vld [vmem:[#allocation7 + $0x70] sm:$0xff] }
  0x48   :  { %1391 = vmatpush3.bf16.msra.mxu0 %v1388_v63  ;;  %v1806_v60 = vpack.c.bf16 %v370_v54, %v369_v53  ;;  %v372_v63 = vld [vmem:[%s2288_s1 + $0x28] sm:$0xff]  ;;  %v1816_v5 = vld [vmem:[#allocation7 + $0x78] sm:$0xff]  ;;  %v156_v9 = vadd.f32 %v140_v51, %v1814_v0  ;;  %v373_v15 = vld [vmem:[%s2288_s1 + $0x30] sm:$0xff] }
  0x49   :  { %1393 = vmatprep.subr.bf16.mxu0 %v1392_v16  ;;  %1413 = vmatprep.subr.bf16.mxu1 %v1796_v52  ;;  %v1821_v6 = vpack.c.bf16 %v372_v63, %v371_v62  ;;  %v1404_v8 = vpack.c.bf16 %v155_v56, %v154_v50  ;;  %v157_v10 = vadd.f32 %v141_v59, %v1816_v5  ;;  %v375_v22 = vld [vmem:[%s2288_s1 + $0x40] sm:$0xff]  ;;  %v376_v23 = vld [vmem:[%s2288_s1 + $0x48] sm:$0xff]  ;;  %v378_v31 = vld [vmem:[%s2288_s1 + $0x58] sm:$0xff] }
  0x4a   :  { %1415 = vmatpush3.bf16.msra.mxu1 %v1796_v52  ;;  %v1843_v28 = vpack.c.bf16 %v376_v23, %v375_v22  ;;  %v1855_v32 = vld [vmem:[%s2287_s0 + $0x8] sm:$0xff]  ;;  %v1863_v37 = vld [vmem:[%s2287_s0 + $0x10] sm:$0xff]  ;;  %v1871_v39 = vld [vmem:[%s2287_s0 + $0x18] sm:$0xff] }
  0x4b   :  { %1417 = vmatprep.subr.bf16.mxu1 %v1806_v60  ;;  %v1408_v20 = vpack.c.bf16 %v157_v10, %v156_v9  ;;  %2307 = vst [vmem:[#allocation12_spill] sm:$0xff] %v1863_v37  ;;  %2308 = vst [vmem:[#allocation13_spill] sm:$0xff] %v1871_v39  ;;  %v1877_v42 = vld [vmem:[%s2287_s0 + $0x20] sm:$0xff]  ;;  %v1885_v46 = vld [vmem:[%s2287_s0 + $0x28] sm:$0xff] }
  0x4c   :  { %1395 = vmatpush3.bf16.msra.mxu0 %v1392_v16  ;;  %v374_v16 = vld [vmem:[%s2288_s1 + $0x38] sm:$0xff]  ;;  %2309 = vst [vmem:[#allocation14_spill] sm:$0xff] %v1877_v42  ;;  %2310 = vst [vmem:[#allocation15_spill] sm:$0xff] %v1885_v46  ;;  %v1890_v49 = vld [vmem:[%s2287_s0 + $0x30] sm:$0xff] }
  0x4d   :  { %1397 = vmatprep.subr.bf16.mxu0 %v1396_v30  ;;  %v1833_v19 = vpack.c.bf16 %v374_v16, %v373_v15  ;;  %2311 = vst [vmem:[#allocation16_spill] sm:$0xff] %v1890_v49  ;;  %v1897_v50 = vld [vmem:[%s2287_s0 + $0x38] sm:$0xff]  ;;  %v1902_v51 = vld [vmem:[%s2287_s0 + $0x40] sm:$0xff]  ;;  %v1909_v53 = vld [vmem:[%s2287_s0 + $0x48] sm:$0xff] }
  0x4e   :  { %1419 = vmatpush3.bf16.msra.mxu1 %v1806_v60  ;;  %2312 = vst [vmem:[#allocation17_spill] sm:$0xff] %v1897_v50  ;;  %2313 = vst [vmem:[#allocation18_spill] sm:$0xff] %v1902_v51  ;;  %v1914_v54 = vld [vmem:[%s2287_s0 + $0x50] sm:$0xff]  ;;  %v1926_v56 = vld [vmem:[%s2287_s0 + $0x60] sm:$0xff] }
  0x4f   :  { %1421 = vmatprep.subr.bf16.mxu1 %v1821_v6  ;;  %2314 = vst [vmem:[#allocation19_spill] sm:$0xff] %v1909_v53  ;;  %2315 = vst [vmem:[#allocation20_spill] sm:$0xff] %v1914_v54  ;;  %v1933_v59 = vld [vmem:[%s2287_s0 + $0x68] sm:$0xff]  ;;  %v1938_v62 = vld [vmem:[%s2287_s0 + $0x70] sm:$0xff] }
  0x50   :  { %1399 = vmatpush3.bf16.msra.mxu0 %v1396_v30  ;;  %v377_v30 = vld [vmem:[%s2288_s1 + $0x50] sm:$0xff]  ;;  %2317 = vst [vmem:[#allocation22_spill] sm:$0xff] %v1926_v56  ;;  %2318 = vst [vmem:[#allocation23_spill] sm:$0xff] %v1933_v59  ;;  %v1945_v63 = vld [vmem:[%s2287_s0 + $0x78] sm:$0xff] }
  0x51   :  { %1401 = vmatprep.subr.bf16.mxu0 %v1400_v55  ;;  %v1858_v33 = vpack.c.bf16 %v378_v31, %v377_v30  ;;  %2319 = vst [vmem:[#allocation24_spill] sm:$0xff] %v1938_v62  ;;  %2320 = vst [vmem:[#allocation25_spill] sm:$0xff] %v1945_v63  ;;  %v380_v9 = vld [vmem:[%s2288_s1 + $0x68] sm:$0xff]  ;;  %v381_v15 = vld [vmem:[%s2288_s1 + $0x70] sm:$0xff] }
  0x52   :  { %1423 = vmatpush3.bf16.msra.mxu1 %v1821_v6 }
  0x53   :  { %1425 = vmatprep.subr.bf16.mxu1 %v1833_v19 }
  0x54   :  { %1403 = vmatpush3.bf16.msra.mxu0 %v1400_v55  ;;  %v1921_v55 = vld [vmem:[%s2287_s0 + $0x58] sm:$0xff] }
  0x55   :  { %1405 = vmatprep.subr.bf16.mxu0 %v1404_v8  ;;  %2316 = vst [vmem:[#allocation21_spill] sm:$0xff] %v1921_v55 }
  0x56   :  { %1427 = vmatpush3.bf16.msra.mxu1 %v1833_v19 }
  0x57   :  { %1429 = vmatprep.subr.bf16.mxu1 %v1843_v28 }
  0x58   :  { %1407 = vmatpush3.bf16.msra.mxu0 %v1404_v8  ;;  %v379_v8 = vld [vmem:[%s2288_s1 + $0x60] sm:$0xff] }
  0x59   :  { %1409 = vmatprep.subr.bf16.mxu0 %v1408_v20  ;;  %v1955_v10 = vpack.c.bf16 %v380_v9, %v379_v8 }
  0x5a   :  { %1431 = vmatpush3.bf16.msra.mxu1 %v1843_v28 }
  0x5b   :  { %1433 = vmatprep.subr.bf16.mxu1 %v1858_v33 }
  0x5c   :  { %1411 = vmatpush3.bf16.msra.mxu0 %v1408_v20 }
  0x5e   :  { %1435 = vmatpush3.bf16.msra.mxu1 %v1858_v33 }
  0x5f   :  { %1189 = vmatmul.mubr.f32.vlgmr.msra.gmra.mrb[0].mxu0 %v1855_v32  ;;  %1437 = vmatprep.subr.bf16.mxu1 %v1955_v10 }
  0x60   :  { %1191 = vmatprep.mubr.f32.mxu0 %v1863_v37 }
  0x62   :  { %1439 = vmatpush3.bf16.msra.mxu1 %v1955_v10 }
  0x63   :  { %1192 = vmatmul.mubr.f32.gmra.mrb[2].mxu0 %v1871_v39 }
  0x64   :  { %1194 = vmatprep.mubr.f32.mxu0 %v1877_v42 }
  0x67   :  { %1195 = vmatmul.mubr.f32.gmra.mrb[4].mxu0 %v1885_v46 }
  0x68   :  { %1197 = vmatprep.mubr.f32.mxu0 %v1890_v49 }
  0x6b   :  { %1198 = vmatmul.mubr.f32.gmra.mrb[6].mxu0 %v1897_v50 }
  0x6c   :  { %1200 = vmatprep.mubr.f32.mxu0 %v1902_v51 }
  0x6f   :  { %1201 = vmatmul.mubr.f32.gmra.mrb[8].mxu0 %v1909_v53 }
  0x70   :  { %1203 = vmatprep.mubr.f32.mxu0 %v1914_v54 }
  0x73   :  { %1204 = vmatmul.mubr.f32.gmra.mrb[10].mxu0 %v1921_v55 }
  0x74   :  { %1206 = vmatprep.mubr.f32.mxu0 %v1926_v56 }
  0x77   :  { %1207 = vmatmul.mubr.f32.gmra.mrb[12].mxu0 %v1933_v59 }
  0x78   :  { %1209 = vmatprep.mubr.f32.mxu0 %v1938_v62 }
  0x7b   :  { %1210 = vmatmul.mubr.f32.gmra.mrb[14].mxu0 %v1945_v63 }
  0x7c   :  { %1300 = vmatprep.mubr.f32.mxu0 %v1773_v29  ;;  %v382_v29 = vld [vmem:[%s2288_s1 + $0x78] sm:$0xff]  ;;  %s1613_s1 = smov [#allocation8]  }
  0x7d   :  { %v1965_v16 = vpack.c.bf16 %v382_v29, %v381_v15  ;;  %s1015_s16 = sshll.u32 %s1613_s1, 4  ;;  %s1016_s16 = int_to_ptr.vmem [resolvable:$true] %s1015_s16 }
  0x7e   :  { %s1580_s3 = scalar_lea.vmem %s1016_s16, 2048  ;;  %p1585_p11 = scmp.lt.s32.totalorder %s1016_s16, %s1016_s16 }
  0x7f   :  { %1441 = vmatprep.subr.bf16.mxu1 %v1965_v16  ;;  %p1581_p10 = scmp.ne.s32.totalorder %s1016_s16, %s1580_s3  ;;  %p1586_p12 = scmp.lt.s32.totalorder %s1580_s3, %s1580_s3 }
  0x80   :  { %1443 = vmatpush3.bf16.msra.mxu1 %v1965_v16 }
  0x81   :  { %1477 = vmatprep.subr.bf16.mxu1 %v1796_v52  ;;  %p1587_p13 = por %p1586_p12, %p1585_p11 }
  0x83   :  { %p1588_p0 = pnand %p1587_p13, %p1581_p10 }
 0x132   :  { %v1970_v20 = vpop.f32.mrb[0].mxu0 }
 0x133   :  { %v320_v22 = vmul.f32 0.5, %v1970_v20  ;;  %v1973_v23 = vpop.f32.mrb[1].mxu0 }
 0x134   :  { %v319_v30 = vmul.f32 0.5, %v1973_v23 }
 0x135   :  { %v336_v31 = vadd.f32 %v320_v22, %v1700_v4 }
 0x136   :  { %v1977_v8 = vpop.f32.mrb[2].mxu0  ;;  %v335_v9 = vadd.f32 %v319_v30, %v1698_v3 }
 0x137   :  { %v322_v15 = vmul.f32 0.5, %v1977_v8  ;;  %v1981_v29 = vpop.f32.mrb[3].mxu0  ;;  %v352_v56 = vsub.f32 %v336_v31, %v1702_v7 }
 0x138   :  { %v321_v63 = vmul.f32 0.5, %v1981_v29  ;;  %v351_v62 = vsub.f32 %v335_v9, %v1696_v2 }
 0x139   :  { %v338_v59 = vadd.f32 %v322_v15, %v1710_v14 }
 0x13a   :  { %v337_v55 = vadd.f32 %v321_v63, %v1708_v13  ;;  %v1988_v54 = vpop.f32.mrb[4].mxu0  ;;  %1244 = vmatprep.mubr.f32.mxu1 %v351_v62 }
 0x13b   :  { %v324_v22 = vmul.f32 0.5, %v1988_v54  ;;  %v1991_v30 = vpop.f32.mrb[5].mxu0  ;;  %1245 = vmatmul.mubr.f32.vlgmr.msra.gmra.mrb[0].mxu1 %v352_v56  ;;  %v354_v31 = vsub.f32 %v338_v59, %v1712_v17 }
 0x13c   :  { %v323_v53 = vmul.f32 0.5, %v1991_v30  ;;  %v353_v51 = vsub.f32 %v337_v55, %v1706_v12  ;;  %1479 = vmatpush3.bf16.msra.mxu1 %v1796_v52 }
 0x13d   :  { %v340_v9 = vadd.f32 %v324_v22, %v1720_v25  ;;  %1481 = vmatprep.subr.bf16.mxu1 %v1806_v60 }
 0x13e   :  { %v339_v63 = vadd.f32 %v323_v53, %v1718_v24  ;;  %v2000_v62 = vpop.f32.mrb[6].mxu0  ;;  %1247 = vmatprep.mubr.f32.mxu1 %v353_v51 }
 0x13f   :  { %v326_v15 = vmul.f32 0.5, %v2000_v62  ;;  %v2003_v56 = vpop.f32.mrb[7].mxu0  ;;  %1248 = vmatmul.mubr.f32.gmra.mrb[2].mxu1 %v354_v31  ;;  %v356_v22 = vsub.f32 %v340_v9, %v1726_v34 }
 0x140   :  { %v325_v55 = vmul.f32 0.5, %v2003_v56  ;;  %v355_v52 = vsub.f32 %v339_v63, %v1722_v26  ;;  %1483 = vmatpush3.bf16.msra.mxu1 %v1806_v60 }
 0x141   :  { %v342_v59 = vadd.f32 %v326_v15, %v1730_v36  ;;  %1485 = vmatprep.subr.bf16.mxu1 %v1821_v6 }
 0x142   :  { %v341_v53 = vadd.f32 %v325_v55, %v1728_v35  ;;  %v2012_v51 = vpop.f32.mrb[8].mxu0  ;;  %1250 = vmatprep.mubr.f32.mxu1 %v355_v52 }
 0x143   :  { %v328_v50 = vmul.f32 0.5, %v2012_v51  ;;  %v2015_v31 = vpop.f32.mrb[9].mxu0  ;;  %1251 = vmatmul.mubr.f32.gmra.mrb[4].mxu1 %v356_v22  ;;  %v358_v15 = vsub.f32 %v342_v59, %v1736_v45 }
 0x144   :  { %v327_v63 = vmul.f32 0.5, %v2015_v31  ;;  %v357_v60 = vsub.f32 %v341_v53, %v1734_v40  ;;  %1487 = vmatpush3.bf16.msra.mxu1 %v1821_v6 }
 0x145   :  { %v344_v9 = vadd.f32 %v328_v50, %v1741_v48  ;;  %1489 = vmatprep.subr.bf16.mxu1 %v1833_v19 }
 0x146   :  { %v343_v55 = vadd.f32 %v327_v63, %v1739_v47  ;;  %v2024_v52 = vpop.f32.mrb[10].mxu0  ;;  %1253 = vmatprep.mubr.f32.mxu1 %v357_v60 }
 0x147   :  { %v330_v49 = vmul.f32 0.5, %v2024_v52  ;;  %v2027_v22 = vpop.f32.mrb[11].mxu0  ;;  %1254 = vmatmul.mubr.f32.gmra.mrb[6].mxu1 %v358_v15  ;;  %v360_v59 = vsub.f32 %v344_v9, %v1749_v58 }
 0x148   :  { %v329_v53 = vmul.f32 0.5, %v2027_v22  ;;  %v359_v6 = vsub.f32 %v343_v55, %v1747_v57  ;;  %1491 = vmatpush3.bf16.msra.mxu1 %v1833_v19 }
 0x149   :  { %v346_v50 = vadd.f32 %v330_v49, %v1756_v1  ;;  %1493 = vmatprep.subr.bf16.mxu1 %v1843_v28 }
 0x14a   :  { %v345_v63 = vadd.f32 %v329_v53, %v1753_v61  ;;  %v2036_v60 = vpop.f32.mrb[12].mxu0  ;;  %1256 = vmatprep.mubr.f32.mxu1 %v359_v6 }
 0x14b   :  { %v332_v46 = vmul.f32 0.5, %v2036_v60  ;;  %v2039_v15 = vpop.f32.mrb[13].mxu0  ;;  %1257 = vmatmul.mubr.f32.gmra.mrb[8].mxu1 %v360_v59  ;;  %v362_v9 = vsub.f32 %v346_v50, %v1762_v18 }
 0x14c   :  { %v331_v55 = vmul.f32 0.5, %v2039_v15  ;;  %v361_v19 = vsub.f32 %v345_v63, %v1760_v11  ;;  %1495 = vmatpush3.bf16.msra.mxu1 %v1843_v28 }
 0x14d   :  { %v348_v49 = vadd.f32 %v332_v46, %v1768_v27  ;;  %1497 = vmatprep.subr.bf16.mxu1 %v1858_v33 }
 0x14e   :  { %v347_v53 = vadd.f32 %v331_v55, %v1766_v21  ;;  %v2048_v6 = vpop.f32.mrb[14].mxu0  ;;  %1259 = vmatprep.mubr.f32.mxu1 %v361_v19 }
 0x14f   :  { %v334_v42 = vmul.f32 0.5, %v2048_v6  ;;  %v2051_v59 = vpop.f32.mrb[15].mxu0  ;;  %1260 = vmatmul.mubr.f32.gmra.mrb[10].mxu1 %v362_v9  ;;  %v364_v50 = vsub.f32 %v348_v49, %v1784_v43 }
 0x150   :  { %v333_v63 = vmul.f32 0.5, %v2051_v59  ;;  %v363_v28 = vsub.f32 %v347_v53, %v1779_v38  ;;  %1499 = vmatpush3.bf16.msra.mxu1 %v1858_v33 }
 0x151   :  { %v350_v46 = vadd.f32 %v334_v42, %v1786_v44  ;;  %1501 = vmatprep.subr.bf16.mxu1 %v1955_v10 }
 0x152   :  { %v349_v55 = vadd.f32 %v333_v63, %v1782_v41  ;;  %1262 = vmatprep.mubr.f32.mxu1 %v363_v28 }
 0x153   :  { %1263 = vmatmul.mubr.f32.gmra.mrb[12].mxu1 %v364_v50  ;;  %v366_v9 = vsub.f32 %v350_v46, %v1816_v5 }
 0x154   :  { %v365_v19 = vsub.f32 %v349_v55, %v1814_v0  ;;  %1503 = vmatpush3.bf16.msra.mxu1 %v1955_v10 }
 0x155   :  { %1505 = vmatprep.subr.bf16.mxu1 %v1965_v16 }
 0x156   :  { %1265 = vmatprep.mubr.f32.mxu1 %v365_v19 }
 0x157   :  { %1266 = vmatmul.mubr.f32.gmra.mrb[14].mxu1 %v366_v9 }
 0x158   :  { %1507 = vmatpush3.bf16.msra.mxu1 %v1965_v16 }
 0x20e   :  { %v1246_v33 = vpop.f32.mrb[0].mxu1 }
 0x20f   :  { %v529_v42 = vsub.f32 %v1246_v33, %v1970_v20  ;;  %v577_v49 = vmul.f32 0.5, %v1246_v33  ;;  %v449_v53 = vpop.f32.mrb[1].mxu1 }
 0x210   :  { %v528_v63 = vsub.f32 %v449_v53, %v1973_v23  ;;  %v576_v28 = vmul.f32 0.5, %v449_v53 }
 0x211   :  { %v545_v50 = vmul.f32 0.5, %v529_v42  ;;  %v593_v46 = vadd.f32 %v577_v49, %v1700_v4 }
 0x212   :  { %v544_v55 = vmul.f32 0.5, %v528_v63  ;;  %v1249_v39 = vpop.f32.mrb[2].mxu1  ;;  %v592_v20 = vadd.f32 %v576_v28, %v1698_v3 }
 0x213   :  { %v2068_v10 = vadd.f32 %v545_v50, %v1702_v7  ;;  %v531_v19 = vsub.f32 %v1249_v39, %v1977_v8  ;;  %v579_v9 = vmul.f32 0.5, %v1249_v39  ;;  %v459_v16 = vpop.f32.mrb[3].mxu1 }
 0x214   :  { %v2073_v37 = vadd.f32 %v544_v55, %v1696_v2  ;;  %v530_v23 = vsub.f32 %v459_v16, %v1981_v29  ;;  %v578_v33 = vmul.f32 0.5, %v459_v16 }
 0x215   :  { %v609_v42 = vadd.f32 %v593_v46, %v2068_v10  ;;  %v547_v53 = vmul.f32 0.5, %v531_v19  ;;  %v595_v63 = vadd.f32 %v579_v9, %v1710_v14 }
 0x216   :  { %v608_v7 = vadd.f32 %v592_v20, %v2073_v37  ;;  %v546_v49 = vmul.f32 0.5, %v530_v23  ;;  %v1252_v50 = vpop.f32.mrb[4].mxu1  ;;  %v594_v2 = vadd.f32 %v578_v33, %v1708_v13 }
 0x217   :  { %v2081_v39 = vadd.f32 %v547_v53, %v1712_v17  ;;  %v533_v8 = vsub.f32 %v1252_v50, %v1988_v54  ;;  %v581_v28 = vmul.f32 0.5, %v1252_v50  ;;  %v469_v55 = vpop.f32.mrb[5].mxu1 }
 0x218   :  { %v2086_v29 = vadd.f32 %v546_v49, %v1706_v12  ;;  %v532_v46 = vsub.f32 %v469_v55, %v1991_v30  ;;  %v580_v19 = vmul.f32 0.5, %v469_v55  ;;  %v1444_v16 = vpack.c.bf16 %v609_v42, %v608_v7 }
 0x219   :  { %v611_v9 = vadd.f32 %v595_v63, %v2081_v39  ;;  %v549_v20 = vmul.f32 0.5, %v533_v8  ;;  %v597_v17 = vadd.f32 %v581_v28, %v1720_v25 }
 0x21a   :  { %v610_v23 = vadd.f32 %v594_v2, %v2086_v29  ;;  %v548_v53 = vmul.f32 0.5, %v532_v46  ;;  %v1255_v33 = vpop.f32.mrb[6].mxu1  ;;  %1445 = vmatprep.subr.bf16.mxu0 %v1444_v16  ;;  %v596_v12 = vadd.f32 %v580_v19, %v1718_v24 }
 0x21b   :  { %v2093_v54 = vadd.f32 %v549_v20, %v1726_v34  ;;  %v535_v49 = vsub.f32 %v1255_v33, %v2000_v62  ;;  %v583_v30 = vmul.f32 0.5, %v1255_v33  ;;  %v479_v50 = vpop.f32.mrb[7].mxu1  ;;  %1447 = vmatpush3.bf16.msra.mxu0 %v1444_v16 }
 0x21c   :  { %v2098_v42 = vadd.f32 %v548_v53, %v1722_v26  ;;  %v534_v7 = vsub.f32 %v479_v50, %v2003_v56  ;;  %v582_v63 = vmul.f32 0.5, %v479_v50  ;;  %v1448_v2 = vpack.c.bf16 %v611_v9, %v610_v23 }
 0x21d   :  { %v613_v8 = vadd.f32 %v597_v17, %v2093_v54  ;;  %v551_v28 = vmul.f32 0.5, %v535_v49  ;;  %v599_v55 = vadd.f32 %v583_v30, %v1730_v36 }
 0x21e   :  { %v612_v34 = vadd.f32 %v596_v12, %v2098_v42  ;;  %v550_v46 = vmul.f32 0.5, %v534_v7  ;;  %v1258_v19 = vpop.f32.mrb[8].mxu1  ;;  %1449 = vmatprep.subr.bf16.mxu0 %v1448_v2  ;;  %v598_v26 = vadd.f32 %v582_v63, %v1728_v35 }
 0x21f   :  { %v2105_v62 = vadd.f32 %v551_v28, %v1736_v45  ;;  %v537_v16 = vsub.f32 %v1258_v19, %v2012_v51  ;;  %v585_v56 = vmul.f32 0.5, %v1258_v19  ;;  %v489_v20 = vpop.f32.mrb[9].mxu1  ;;  %1451 = vmatpush3.bf16.msra.mxu0 %v1448_v2 }
 0x220   :  { %v2110_v9 = vadd.f32 %v550_v46, %v1734_v40  ;;  %v536_v23 = vsub.f32 %v489_v20, %v2015_v31  ;;  %v584_v17 = vmul.f32 0.5, %v489_v20  ;;  %v1452_v53 = vpack.c.bf16 %v613_v8, %v612_v34 }
 0x221   :  { %v615_v33 = vadd.f32 %v599_v55, %v2105_v62  ;;  %v553_v12 = vmul.f32 0.5, %v537_v16  ;;  %v601_v49 = vadd.f32 %v585_v56, %v1741_v48 }
 0x222   :  { %v614_v45 = vadd.f32 %v598_v26, %v2110_v9  ;;  %v552_v30 = vmul.f32 0.5, %v536_v23  ;;  %v1261_v50 = vpop.f32.mrb[10].mxu1  ;;  %1453 = vmatprep.subr.bf16.mxu0 %v1452_v53  ;;  %v600_v40 = vadd.f32 %v584_v17, %v1739_v47 }
 0x223   :  { %v2117_v51 = vadd.f32 %v553_v12, %v1749_v58  ;;  %v539_v7 = vsub.f32 %v1261_v50, %v2024_v52  ;;  %v587_v31 = vmul.f32 0.5, %v1261_v50  ;;  %v499_v63 = vpop.f32.mrb[11].mxu1  ;;  %1455 = vmatpush3.bf16.msra.mxu0 %v1452_v53 }
 0x224   :  { %v2122_v2 = vadd.f32 %v552_v30, %v1747_v57  ;;  %v538_v8 = vsub.f32 %v499_v63, %v2027_v22  ;;  %v586_v28 = vmul.f32 0.5, %v499_v63  ;;  %v1456_v34 = vpack.c.bf16 %v615_v33, %v614_v45 }
 0x225   :  { %v617_v55 = vadd.f32 %v601_v49, %v2117_v51  ;;  %v555_v46 = vmul.f32 0.5, %v539_v7  ;;  %v603_v19 = vadd.f32 %v587_v31, %v1756_v1 }
 0x226   :  { %v616_v58 = vadd.f32 %v600_v40, %v2122_v2  ;;  %v554_v26 = vmul.f32 0.5, %v538_v8  ;;  %v1264_v16 = vpop.f32.mrb[12].mxu1  ;;  %1457 = vmatprep.subr.bf16.mxu0 %v1456_v34  ;;  %v602_v57 = vadd.f32 %v586_v28, %v1753_v61 }
 0x227   :  { %v2129_v52 = vadd.f32 %v555_v46, %v1762_v18  ;;  %v541_v56 = vsub.f32 %v1264_v16, %v2036_v60  ;;  %v589_v22 = vmul.f32 0.5, %v1264_v16  ;;  %v509_v20 = vpop.f32.mrb[13].mxu1  ;;  %1459 = vmatpush3.bf16.msra.mxu0 %v1456_v34 }
 0x228   :  { %v2134_v23 = vadd.f32 %v554_v26, %v1760_v11  ;;  %v540_v17 = vsub.f32 %v509_v20, %v2039_v15  ;;  %v588_v53 = vmul.f32 0.5, %v509_v20  ;;  %v1460_v33 = vpack.c.bf16 %v617_v55, %v616_v58  ;;  %v2325_v20 = vld [vmem:[#allocation16_spill] sm:$0xff] }
 0x229   :  { %v619_v12 = vadd.f32 %v603_v19, %v2129_v52  ;;  %v557_v45 = vmul.f32 0.5, %v541_v56  ;;  %v605_v49 = vadd.f32 %v589_v22, %v1768_v27  ;;  %v2322_v56 = vld [vmem:[#allocation13_spill] sm:$0xff]  ;;  %v2324_v22 = vld [vmem:[#allocation15_spill] sm:$0xff] }
 0x22a   :  { %v618_v18 = vadd.f32 %v602_v57, %v2134_v23  ;;  %v556_v30 = vmul.f32 0.5, %v540_v17  ;;  %v1267_v50 = vpop.f32.mrb[14].mxu1  ;;  %1461 = vmatprep.subr.bf16.mxu0 %v1460_v33  ;;  %v604_v11 = vadd.f32 %v588_v53, %v1766_v21  ;;  %v2326_v17 = vld [vmem:[#allocation17_spill] sm:$0xff]  ;;  %v2327_v53 = vld [vmem:[#allocation18_spill] sm:$0xff] }
 0x22b   :  { %v2141_v60 = vadd.f32 %v557_v45, %v1784_v43  ;;  %v543_v40 = vsub.f32 %v1267_v50, %v2048_v6  ;;  %v591_v15 = vmul.f32 0.5, %v1267_v50  ;;  %v519_v7 = vpop.f32.mrb[15].mxu1  ;;  %1463 = vmatpush3.bf16.msra.mxu0 %v1460_v33  ;;  %v2328_v33 = vld [vmem:[#allocation19_spill] sm:$0xff]  ;;  %v2330_v45 = vld [vmem:[#allocation21_spill] sm:$0xff] }
 0x22c   :  { %v2146_v31 = vadd.f32 %v556_v30, %v1779_v38  ;;  %v542_v63 = vsub.f32 %v519_v7, %v2051_v59  ;;  %v590_v8 = vmul.f32 0.5, %v519_v7  ;;  %v1464_v28 = vpack.c.bf16 %v619_v12, %v618_v18  ;;  %v2329_v12 = vld [vmem:[#allocation20_spill] sm:$0xff]  ;;  %v2332_v18 = vld [vmem:[#allocation23_spill] sm:$0xff]  ;;  %v2334_v30 = vld [vmem:[#allocation25_spill] sm:$0xff] }
 0x22d   :  { %v621_v34 = vadd.f32 %v605_v49, %v2141_v60  ;;  %v559_v55 = vmul.f32 0.5, %v543_v40  ;;  %v607_v6 = vadd.f32 %v591_v15, %v1786_v44  ;;  %v2333_v49 = vld [vmem:[#allocation24_spill] sm:$0xff] }
 0x22e   :  { %v620_v43 = vadd.f32 %v604_v11, %v2146_v31  ;;  %v558_v46 = vmul.f32 0.5, %v542_v63  ;;  %1465 = vmatprep.subr.bf16.mxu0 %v1464_v28  ;;  %v606_v59 = vadd.f32 %v590_v8, %v1782_v41 }
 0x22f   :  { %v2152_v58 = vadd.f32 %v559_v55, %v1816_v5  ;;  %1467 = vmatpush3.bf16.msra.mxu0 %v1464_v28  ;;  %v2321_v5 = vld [vmem:[#allocation12_spill] sm:$0xff] }
 0x230   :  { %v2156_v38 = vadd.f32 %v558_v46, %v1814_v0  ;;  %v1468_v19 = vpack.c.bf16 %v621_v34, %v620_v43  ;;  %v2323_v0 = vld [vmem:[#allocation14_spill] sm:$0xff] }
 0x231   :  { %v623_v26 = vadd.f32 %v607_v6, %v2152_v58 }
 0x232   :  { %v622_v16 = vadd.f32 %v606_v59, %v2156_v38  ;;  %1469 = vmatprep.subr.bf16.mxu0 %v1468_v19 }
 0x233   :  { %1471 = vmatpush3.bf16.msra.mxu0 %v1468_v19 }
 0x234   :  { %v1472_v57 = vpack.c.bf16 %v623_v26, %v622_v16 }
 0x236   :  { %1473 = vmatprep.subr.bf16.mxu0 %v1472_v57 }
 0x237   :  { %1475 = vmatpush3.bf16.msra.mxu0 %v1472_v57 }
 0x23a   :  { %1301 = vmatmul.mubr.f32.vlgmr.msra.gmra.mrb[16].mxu0 %v1855_v32  ;;  %v2331_v32 = vld [vmem:[#allocation22_spill] sm:$0xff] }
 0x23b   :  { %1303 = vmatprep.mubr.f32.mxu0 %v2321_v5 }
 0x23e   :  { %1304 = vmatmul.mubr.f32.gmra.mrb[18].mxu0 %v2322_v56 }
 0x23f   :  { %1306 = vmatprep.mubr.f32.mxu0 %v2323_v0 }
 0x242   :  { %1307 = vmatmul.mubr.f32.gmra.mrb[20].mxu0 %v2324_v22 }
 0x243   :  { %1309 = vmatprep.mubr.f32.mxu0 %v2325_v20 }
 0x246   :  { %1310 = vmatmul.mubr.f32.gmra.mrb[22].mxu0 %v2326_v17 }
 0x247   :  { %1312 = vmatprep.mubr.f32.mxu0 %v2327_v53 }
 0x24a   :  { %1313 = vmatmul.mubr.f32.gmra.mrb[24].mxu0 %v2328_v33 }
 0x24b   :  { %1315 = vmatprep.mubr.f32.mxu0 %v2329_v12 }
 0x24e   :  { %1316 = vmatmul.mubr.f32.gmra.mrb[26].mxu0 %v2330_v45 }
 0x24f   :  { %1318 = vmatprep.mubr.f32.mxu0 %v2331_v32 }
 0x252   :  { %1319 = vmatmul.mubr.f32.gmra.mrb[28].mxu0 %v2332_v18 }
 0x253   :  { %1321 = vmatprep.mubr.f32.mxu0 %v2333_v49 }
 0x256   :  { %1322 = vmatmul.mubr.f32.gmra.mrb[30].mxu0 %v2334_v30 }
 0x30d   :  { %v2176_v50 = vpop.f32.mrb[16].mxu0 }
 0x30e   :  { %v770_v11 = vmul.f32 0.5, %v2176_v50  ;;  %v2179_v40 = vpop.f32.mrb[17].mxu0 }
 0x30f   :  { %v769_v15 = vmul.f32 0.5, %v2179_v40 }
 0x310   :  { %v786_v7 = vadd.f32 %v770_v11, %v1700_v4 }
 0x311   :  { %v785_v63 = vadd.f32 %v769_v15, %v1698_v3  ;;  %v2184_v8 = vpop.f32.mrb[18].mxu0 }
 0x312   :  { %v772_v28 = vmul.f32 0.5, %v2184_v8  ;;  %v2187_v34 = vpop.f32.mrb[19].mxu0  ;;  %v802_v46 = vsub.f32 %v786_v7, %v2068_v10 }
 0x313   :  { %v771_v55 = vmul.f32 0.5, %v2187_v34  ;;  %v801_v43 = vsub.f32 %v785_v63, %v2073_v37 }
 0x314   :  { %v788_v6 = vadd.f32 %v772_v28, %v1710_v14 }
 0x315   :  { %v787_v59 = vadd.f32 %v771_v55, %v1708_v13  ;;  %v2194_v19 = vpop.f32.mrb[20].mxu0  ;;  %1356 = vmatprep.mubr.f32.mxu1 %v801_v43 }
 0x316   :  { %v774_v3 = vmul.f32 0.5, %v2194_v19  ;;  %v2197_v4 = vpop.f32.mrb[21].mxu0  ;;  %1357 = vmatmul.mubr.f32.vlgmr.msra.gmra.mrb[16].mxu1 %v802_v46  ;;  %v804_v10 = vsub.f32 %v788_v6, %v2081_v39 }
 0x317   :  { %v773_v26 = vmul.f32 0.5, %v2197_v4  ;;  %v803_v16 = vsub.f32 %v787_v59, %v2086_v29 }
 0x318   :  { %v790_v37 = vadd.f32 %v774_v3, %v1720_v25 }
 0x319   :  { %v789_v14 = vadd.f32 %v773_v26, %v1718_v24  ;;  %v2204_v57 = vpop.f32.mrb[22].mxu0  ;;  %1359 = vmatprep.mubr.f32.mxu1 %v803_v16 }
 0x31a   :  { %v776_v13 = vmul.f32 0.5, %v2204_v57  ;;  %v2207_v5 = vpop.f32.mrb[23].mxu0  ;;  %1360 = vmatmul.mubr.f32.gmra.mrb[18].mxu1 %v804_v10  ;;  %v806_v25 = vsub.f32 %v790_v37, %v2093_v54 }
 0x31b   :  { %v775_v56 = vmul.f32 0.5, %v2207_v5  ;;  %v805_v0 = vsub.f32 %v789_v14, %v2098_v42 }
 0x31c   :  { %v792_v29 = vadd.f32 %v776_v13, %v1730_v36 }
 0x31d   :  { %v791_v39 = vadd.f32 %v775_v56, %v1728_v35  ;;  %v2214_v22 = vpop.f32.mrb[24].mxu0  ;;  %1362 = vmatprep.mubr.f32.mxu1 %v805_v0 }
 0x31e   :  { %v778_v24 = vmul.f32 0.5, %v2214_v22  ;;  %v2217_v20 = vpop.f32.mrb[25].mxu0  ;;  %1363 = vmatmul.mubr.f32.gmra.mrb[20].mxu1 %v806_v25  ;;  %v808_v36 = vsub.f32 %v792_v29, %v2105_v62 }
 0x31f   :  { %v777_v17 = vmul.f32 0.5, %v2217_v20  ;;  %v807_v53 = vsub.f32 %v791_v39, %v2110_v9 }
 0x320   :  { %v794_v42 = vadd.f32 %v778_v24, %v1741_v48 }
 0x321   :  { %v793_v54 = vadd.f32 %v777_v17, %v1739_v47  ;;  %v2224_v33 = vpop.f32.mrb[26].mxu0  ;;  %1365 = vmatprep.mubr.f32.mxu1 %v807_v53 }
 0x322   :  { %v780_v35 = vmul.f32 0.5, %v2224_v33  ;;  %v2227_v12 = vpop.f32.mrb[27].mxu0  ;;  %1366 = vmatmul.mubr.f32.gmra.mrb[22].mxu1 %v808_v36  ;;  %v810_v48 = vsub.f32 %v794_v42, %v2117_v51 }
 0x323   :  { %v779_v45 = vmul.f32 0.5, %v2227_v12  ;;  %v809_v32 = vsub.f32 %v793_v54, %v2122_v2 }
 0x324   :  { %v796_v9 = vadd.f32 %v780_v35, %v1756_v1 }
 0x325   :  { %v795_v62 = vadd.f32 %v779_v45, %v1753_v61  ;;  %v2234_v18 = vpop.f32.mrb[28].mxu0  ;;  %1368 = vmatprep.mubr.f32.mxu1 %v809_v32 }
 0x326   :  { %v782_v47 = vmul.f32 0.5, %v2234_v18  ;;  %v2237_v49 = vpop.f32.mrb[29].mxu0  ;;  %1369 = vmatmul.mubr.f32.gmra.mrb[24].mxu1 %v810_v48  ;;  %v812_v1 = vsub.f32 %v796_v9, %v2129_v52 }
 0x327   :  { %v781_v30 = vmul.f32 0.5, %v2237_v49  ;;  %v811_v11 = vsub.f32 %v795_v62, %v2134_v23 }
 0x328   :  { %v798_v2 = vadd.f32 %v782_v47, %v1768_v27 }
 0x329   :  { %v797_v51 = vadd.f32 %v781_v30, %v1766_v21  ;;  %v2244_v15 = vpop.f32.mrb[30].mxu0  ;;  %1371 = vmatprep.mubr.f32.mxu1 %v811_v11 }
 0x32a   :  { %v784_v61 = vmul.f32 0.5, %v2244_v15  ;;  %v2247_v7 = vpop.f32.mrb[31].mxu0  ;;  %1372 = vmatmul.mubr.f32.gmra.mrb[26].mxu1 %v812_v1  ;;  %v814_v27 = vsub.f32 %v798_v2, %v2141_v60 }
 0x32b   :  { %v783_v63 = vmul.f32 0.5, %v2247_v7  ;;  %v813_v28 = vsub.f32 %v797_v51, %v2146_v31 }
 0x32c   :  { %v800_v23 = vadd.f32 %v784_v61, %v1786_v44 }
 0x32d   :  { %v799_v52 = vadd.f32 %v783_v63, %v1782_v41  ;;  %1374 = vmatprep.mubr.f32.mxu1 %v813_v28 }
 0x32e   :  { %1375 = vmatmul.mubr.f32.gmra.mrb[28].mxu1 %v814_v27  ;;  %v816_v55 = vsub.f32 %v800_v23, %v2152_v58 }
 0x32f   :  { %v815_v21 = vsub.f32 %v799_v52, %v2156_v38 }
 0x331   :  { %1377 = vmatprep.mubr.f32.mxu1 %v815_v21 }
 0x332   :  { %1378 = vmatmul.mubr.f32.gmra.mrb[30].mxu1 %v816_v55 }
 0x3e9   :  { %v1358_v43 = vpop.f32.mrb[16].mxu1 }
 0x3ea   :  { %v963_v46 = vadd.f32 %v1358_v43, %v2176_v50  ;;  %v883_v6 = vpop.f32.mrb[17].mxu1 }
 0x3eb   :  { %v962_v31 = vadd.f32 %v883_v6, %v2179_v40 }
 0x3ec   :  { %v979_v59 = vmul.f32 0.5, %v963_v46 }
 0x3ed   :  { %v978_v44 = vmul.f32 0.5, %v962_v31  ;;  %v1361_v3 = vpop.f32.mrb[18].mxu1 }
 0x3ee   :  { %995 = vst [vmem:[#allocation8 + $0x8] sm:$0xff] %v979_v59  ;;  %v965_v41 = vadd.f32 %v1361_v3, %v2184_v8  ;;  %v893_v60 = vpop.f32.mrb[19].mxu1 }
 0x3ef   :  { %994 = vst [vmem:[#allocation8] sm:$0xff] %v978_v44  ;;  %v964_v38 = vadd.f32 %v893_v60, %v2187_v34 }
 0x3f0   :  { %v981_v26 = vmul.f32 0.5, %v965_v41 }
 0x3f1   :  { %v980_v58 = vmul.f32 0.5, %v964_v38  ;;  %v1364_v16 = vpop.f32.mrb[20].mxu1 }
 0x3f2   :  { %997 = vst [vmem:[#allocation8 + $0x18] sm:$0xff] %v981_v26  ;;  %v967_v37 = vadd.f32 %v1364_v16, %v2194_v19  ;;  %v903_v50 = vpop.f32.mrb[21].mxu1 }
 0x3f3   :  { %996 = vst [vmem:[#allocation8 + $0x10] sm:$0xff] %v980_v58  ;;  %v966_v40 = vadd.f32 %v903_v50, %v2197_v4 }
 0x3f4   :  { %v983_v10 = vmul.f32 0.5, %v967_v37 }
 0x3f5   :  { %v982_v14 = vmul.f32 0.5, %v966_v40  ;;  %v1367_v13 = vpop.f32.mrb[22].mxu1 }
 0x3f6   :  { %999 = vst [vmem:[#allocation8 + $0x28] sm:$0xff] %v983_v10  ;;  %v969_v8 = vadd.f32 %v1367_v13, %v2204_v57  ;;  %v913_v56 = vpop.f32.mrb[23].mxu1 }
 0x3f7   :  { %998 = vst [vmem:[#allocation8 + $0x20] sm:$0xff] %v982_v14  ;;  %v968_v34 = vadd.f32 %v913_v56, %v2207_v5 }
 0x3f8   :  { %v985_v0 = vmul.f32 0.5, %v969_v8 }
 0x3f9   :  { %v984_v29 = vmul.f32 0.5, %v968_v34  ;;  %v1370_v25 = vpop.f32.mrb[24].mxu1 }
 0x3fa   :  { %1001 = vst [vmem:[#allocation8 + $0x38] sm:$0xff] %v985_v0  ;;  %v971_v19 = vadd.f32 %v1370_v25, %v2214_v22  ;;  %v923_v39 = vpop.f32.mrb[25].mxu1 }
 0x3fb   :  { %1000 = vst [vmem:[#allocation8 + $0x30] sm:$0xff] %v984_v29  ;;  %v970_v4 = vadd.f32 %v923_v39, %v2217_v20 }
 0x3fc   :  { %v987_v24 = vmul.f32 0.5, %v971_v19 }
 0x3fd   :  { %v986_v17 = vmul.f32 0.5, %v970_v4  ;;  %v1373_v53 = vpop.f32.mrb[26].mxu1 }
 0x3fe   :  { %1003 = vst [vmem:[#allocation8 + $0x48] sm:$0xff] %v987_v24  ;;  %v973_v57 = vadd.f32 %v1373_v53, %v2224_v33  ;;  %v933_v42 = vpop.f32.mrb[27].mxu1 }
 0x3ff   :  { %1002 = vst [vmem:[#allocation8 + $0x40] sm:$0xff] %v986_v17  ;;  %v972_v5 = vadd.f32 %v933_v42, %v2227_v12 }
 0x400   :  { %v989_v36 = vmul.f32 0.5, %v973_v57 }
 0x401   :  { %v988_v54 = vmul.f32 0.5, %v972_v5  ;;  %v1376_v35 = vpop.f32.mrb[28].mxu1 }
 0x402   :  { %1005 = vst [vmem:[#allocation8 + $0x58] sm:$0xff] %v989_v36  ;;  %v975_v22 = vadd.f32 %v1376_v35, %v2234_v18  ;;  %v943_v45 = vpop.f32.mrb[29].mxu1 }
 0x403   :  { %1004 = vst [vmem:[#allocation8 + $0x50] sm:$0xff] %v988_v54  ;;  %v974_v20 = vadd.f32 %v943_v45, %v2237_v49 }
 0x404   :  { %v991_v32 = vmul.f32 0.5, %v975_v22 }
 0x405   :  { %v990_v9 = vmul.f32 0.5, %v974_v20  ;;  %v1379_v48 = vpop.f32.mrb[30].mxu1 }
 0x406   :  { %1007 = vst [vmem:[#allocation8 + $0x68] sm:$0xff] %v991_v32  ;;  %v977_v33 = vadd.f32 %v1379_v48, %v2244_v15  ;;  %v953_v62 = vpop.f32.mrb[31].mxu1 }
 0x407   :  { %1006 = vst [vmem:[#allocation8 + $0x60] sm:$0xff] %v990_v9  ;;  %v976_v12 = vadd.f32 %v953_v62, %v2247_v7 }
 0x408   :  { %v993_v47 = vmul.f32 0.5, %v977_v33 }
 0x409   :  { %v992_v30 = vmul.f32 0.5, %v976_v12 }
 0x40a   :  { %1009 = vst [vmem:[#allocation8 + $0x78] sm:$0xff] %v993_v47 }
 0x40b   :  { %1008 = vst [vmem:[#allocation8 + $0x70] sm:$0xff] %v992_v30 }
 0x40c   :  { %1591 = shalt.err (!%p1588_p0)
}
 0x40d   :  { %s1592_s19 = scalar_lea.hbm %s2292_s5, 2048 }
 0x40e   :  { %p1593_p1 = scmp.ne.s32.totalorder %s2292_s5, %s1592_s19  ;;  %p1596_p2 = scmp.lt.u32.totalorder %s1592_s19, %s2292_s5 }
 0x410   :  { %p1598_p3 = pnand %p1596_p2, %p1593_p1 }
 0x412   :  { %1601 = shalt.err (!%p1598_p3)
}
 0x413   :  { %1021 = dma.vmem_to_hbm [thread:$0]  %s1016_s16, 2048, %s2292_s5, [#allocation4], %s1610_s30, %s1610_s30, %s1611_s6  }
 0x414   :  { %1606 = dma.done.wait [#allocation4], 2048  }
 0x415   :  { %1607 = vsyncadd [#allocation4], 4294965248 }
 0x416   :  { %1025 = vsyncpa [#allocation3], 1 }
 0x417   :  { %1026 = vsyncpa [#allocation6], 1 }
 0x418   :  { %1027 = vsyncpa [#allocation4], 1 }

</bundles_post_ra>
